<compile_context>
chip_gen: v7x
topology: tpu7x:2x2x1
jax: 0.10.0
libtpu: 0.0.40
codegen_flags: <defaults>
</compile_context>

<pallas_src>
import functools

import jax
import jax.numpy as jnp
import numpy as np
from jax.experimental import pallas as pl
from jax.experimental.pallas import tpu as pltpu

EPS = 1e-5  # PyTorch BatchNorm2d default


# ------------------------------ Pallas kernel ------------------------------- #

def _resnet2_block_kernel(x_ref, w_as_ref, w1b_ref, w1c_ref, sh_ref, msk_ref,
                          o_ref, *, d1, d2, Nb, P, Wo):
    """Whole bottleneck block, channel-major, Nb images per grid step.

    x_ref   : (Nb, d0, P)        input images, NCHW with H*W flattened (P lanes)
    w_as_ref: (d1+d2, d0)  bf16  BN-scaled [stage-a ; shortcut] 1x1 weights
    w1b_ref : (d1, 9*d1)   bf16  BN-scaled 3x3 weights, tap-stacked along K
    w1c_ref : (d2, d1)     bf16  BN-scaled stage-c 1x1 weights
    sh_ref  : (2*d1+2*d2, 1) f32 folded BN shifts [a ; b ; c ; shortcut]
    msk_ref : (9, Nb*P)    f32   0/1 edge-validity mask per 3x3 tap
    o_ref   : (Nb, d2, P)        output images (lane-dense)
    """
    L = Nb * P
    f32 = jnp.float32
    bf16 = jnp.bfloat16

    # All Nb images concatenated along the lane dimension: (d0, L).
    if Nb == 1:
        xcat = x_ref[0]
    else:
        xcat = jnp.concatenate([x_ref[b] for b in range(Nb)], axis=-1)
    xb = xcat.astype(bf16)

    # ---- fused stage-a + projection-shortcut 1x1 convs (shared LHS, one dot)
    ap = jnp.dot(w_as_ref[...], xb, preferred_element_type=f32)    # (d1+d2, L)
    h1 = jnp.maximum(ap[0:d1, :] + sh_ref[0:d1, :], 0.0)           # (d1, L)
    y2 = jnp.maximum(ap[d1:d1 + d2, :]
                     + sh_ref[2 * d1 + d2:2 * d1 + 2 * d2, :], 0.0)  # (d2, L)

    # ---- 3x3 conv (stride 1, pad 1) as ONE matmul over a (9*d1, L) tap stack.
    #      Taps are lane rolls of h1 (XLU) gated by precomputed edge masks;
    #      cross-row / cross-image / circular wraps are exactly the masked-out
    #      positions, so no padded scratch is needed.
    taps = []
    for t in range(9):
        r, c = t // 3 - 1, t % 3 - 1
        if r == 0 and c == 0:
            taps.append(h1.astype(bf16))
            continue
        off = r * Wo + c                               # static lane offset
        rolled = pltpu.roll(h1, (-off) % L, axis=1)    # tap[q] = h1[q + off]
        taps.append((rolled * msk_ref[t:t + 1, :]).astype(bf16))
    tapcat = jnp.concatenate(taps, axis=0)                         # (9*d1, L)

    h2 = jnp.dot(w1b_ref[...], tapcat, preferred_element_type=f32)  # (d1, L)
    h2 = jnp.maximum(h2 + sh_ref[d1:2 * d1, :], 0.0)

    # ---- stage-c 1x1 conv + residual add + final ReLU
    y1 = jnp.dot(w1c_ref[...], h2.astype(bf16),
                 preferred_element_type=f32)                        # (d2, L)
    y1 = jnp.maximum(y1 + sh_ref[2 * d1:2 * d1 + d2, :], 0.0)
    out = jnp.maximum(y1 + y2, 0.0)                                 # (d2, L)

    for b in range(Nb):
        o_ref[b] = out[:, b * P:(b + 1) * P].astype(o_ref.dtype)


# --------------------------- parameter utilities ---------------------------- #

def _fold_bn(bias, bn):
    """conv bias + eval-mode BN -> (per-channel weight scale, additive shift)."""
    gamma, beta, mean, var = bn
    scale = gamma / jnp.sqrt(var + EPS)
    shift = (bias - mean) * scale + beta
    return scale, shift


def init_params(key, options):
    d0, d1, d2, s = options

    def conv_w(k, cout, cin, kh, kw):
        return 0.1 * jax.random.normal(k, (cout, cin, kh, kw), jnp.float32)

    def bn_params(k, c):
        k1, k2, k3, k4 = jax.random.split(k, 4)
        gamma = jax.random.uniform(k1, (c,), jnp.float32, 0.5, 1.5)
        beta = 0.1 * jax.random.normal(k2, (c,), jnp.float32)
        mean = 0.1 * jax.random.normal(k3, (c,), jnp.float32)
        var = jax.random.uniform(k4, (c,), jnp.float32, 0.5, 1.5)
        return gamma, beta, mean, var

    keys = jax.random.split(key, 12)
    p = {}
    p["w1a"] = conv_w(keys[0], d1, d0, 1, 1)
    p["b1a"] = 0.1 * jax.random.normal(keys[1], (d1,), jnp.float32)
    p["bn1a"] = bn_params(keys[2], d1)
    p["w1b"] = conv_w(keys[3], d1, d1, 3, 3)
    p["b1b"] = 0.1 * jax.random.normal(keys[4], (d1,), jnp.float32)
    p["bn1b"] = bn_params(keys[5], d1)
    p["w1c"] = conv_w(keys[6], d2, d1, 1, 1)
    p["b1c"] = 0.1 * jax.random.normal(keys[7], (d2,), jnp.float32)
    p["bn1c"] = bn_params(keys[8], d2)
    p["w2"] = conv_w(keys[9], d2, d0, 1, 1)
    p["b2"] = 0.1 * jax.random.normal(keys[10], (d2,), jnp.float32)
    p["bn2"] = bn_params(keys[11], d2)
    return p


# ------------------------------ forward passes ------------------------------ #

def resnet2_forward_pallas(x_nchw, params, options, *, batch_block=None):
    d0, d1, d2, s = options
    N, C, H, W = x_nchw.shape
    assert C == d0

    # Stride-s subsampling for the 1x1 convs (pad 0): every s-th row/col.
    xs = x_nchw[:, :, ::s, ::s] if s > 1 else x_nchw
    Ho, Wo = xs.shape[2], xs.shape[3]
    P = Ho * Wo
    assert P % 128 == 0, "kernel assumes Ho*Wo is a multiple of 128 (lane-dense)"

    # NCHW is already channel-major; flattening H,W is a free reshape.
    xs = xs.reshape(N, d0, P)

    # Batch blocking: largest divisor of N within a small VMEM budget.
    if batch_block is None:
        per_image = ((d0 + d2) * P * 4 * 2          # in/out blocks, dbl-buffered
                     + 9 * d1 * P * 2               # bf16 tap stack
                     + (2 * d1 + 2 * d2) * P * 4)   # f32 intermediates
        cap = max(1, (4 << 20) // per_image)
        batch_block = 1
        for cand in range(1, N + 1):
            if N % cand == 0 and cand <= cap:
                batch_block = cand
    Nb = batch_block
    assert N % Nb == 0
    L = Nb * P

    # ---- fold eval-mode BN: scale goes into the weights, shift is a bias.
    sc_a, sh_a = _fold_bn(params["b1a"], params["bn1a"])
    sc_b, sh_b = _fold_bn(params["b1b"], params["bn1b"])
    sc_c, sh_c = _fold_bn(params["b1c"], params["bn1c"])
    sc_s, sh_s = _fold_bn(params["b2"], params["bn2"])

    # Stage-a + shortcut share the LHS -> one (d1+d2, d0) weight.
    w_a = sc_a[:, None] * params["w1a"].reshape(d1, d0)
    w_s = sc_s[:, None] * params["w2"].reshape(d2, d0)
    w_as = jnp.concatenate([w_a, w_s], axis=0).astype(jnp.bfloat16)

    # 3x3 conv: tap-stacked (d1, 9*d1) so the 9 taps are ONE matmul (K = 9*d1).
    # Column order (kh, kw, cin) matches the kernel's tap-stack row order.
    w1b = sc_b[:, None, None, None] * params["w1b"]                # (d1,d1,3,3)
    w1b = jnp.transpose(w1b, (0, 2, 3, 1)).reshape(d1, 9 * d1).astype(jnp.bfloat16)

    w1c = (sc_c[:, None] * params["w1c"].reshape(d2, d1)).astype(jnp.bfloat16)

    shifts = jnp.concatenate([sh_a, sh_b, sh_c, sh_s])[:, None]    # (2d1+2d2, 1)
    shifts = shifts.astype(jnp.float32)

    # Precomputed 0/1 edge-validity masks for the 9 taps in concatenated-image
    # lane space (pure numpy at trace time -> a free constant).
    q = np.arange(L)
    p_in = q % P
    row, col = p_in // Wo, p_in % Wo
    masks_np = np.zeros((9, L), np.float32)
    for t in range(9):
        r, c = t // 3 - 1, t % 3 - 1
        ok = ((row + r >= 0) & (row + r < Ho) & (col + c >= 0) & (col + c < Wo))
        masks_np[t] = ok.astype(np.float32)
    masks = jnp.asarray(masks_np)

    kernel = functools.partial(_resnet2_block_kernel,
                               d1=d1, d2=d2, Nb=Nb, P=P, Wo=Wo)

    def const(shape):  # grid-invariant block: fetched once, never re-DMA'd
        return pl.BlockSpec(shape, lambda n: (0,) * len(shape))

    out = pl.pallas_call(
        kernel,
        out_shape=jax.ShapeDtypeStruct((N, d2, P), x_nchw.dtype),
        grid=(N // Nb,),
        in_specs=[
            pl.BlockSpec((Nb, d0, P), lambda n: (n, 0, 0)),   # Nb images / step
            const(w_as.shape),
            const(w1b.shape),
            const(w1c.shape),
            const(shifts.shape),
            const(masks.shape),
        ],
        out_specs=pl.BlockSpec((Nb, d2, P), lambda n: (n, 0, 0)),
        compiler_params=pltpu.CompilerParams(
            dimension_semantics=("parallel",),           # megacore-shardable
            vmem_limit_bytes=32 * 1024 * 1024),          # fits v5e/v6e/v7x
    )(xs, w_as, w1b, w1c, shifts, masks)

    # Lane-dense (N, d2, Ho*Wo) -> NCHW is a free reshape (no transpose pass).
    return out.reshape(N, d2, Ho, Wo)


def resnet2_forward_ref(x, params, options):
    """Pure-JAX f32 reference (NCHW, lax conv) for correctness checking."""
    d0, d1, d2, s = options

    def conv_bn_relu(x, w, b, bn, stride, pad):
        gamma, beta, mean, var = bn
        y = jax.lax.conv_general_dilated(
            x, w, (stride, stride), pad,
            dimension_numbers=("NCHW", "OIHW", "NCHW"))
        y = y + b[None, :, None, None]
        y = (gamma[None, :, None, None] * (y - mean[None, :, None, None])
             / jnp.sqrt(var[None, :, None, None] + EPS)
             + beta[None, :, None, None])
        return jnp.maximum(y, 0.0)

    h = conv_bn_relu(x, params["w1a"], params["b1a"], params["bn1a"], s,
                     ((0, 0), (0, 0)))
    h = conv_bn_relu(h, params["w1b"], params["b1b"], params["bn1b"], 1,
                     ((1, 1), (1, 1)))
    out1 = conv_bn_relu(h, params["w1c"], params["b1c"], params["bn1c"], 1,
                        ((0, 0), (0, 0)))
    out2 = conv_bn_relu(x, params["w2"], params["b2"], params["bn2"], s,
                        ((0, 0), (0, 0)))
    return jnp.maximum(out1 + out2, 0.0)


# ---------------------------------- main ------------------------------------ #

if __name__ == "__main__":
    options = (4, 8, 16, 1)        # d0, d1, d2, stride
    key = jax.random.PRNGKey(0)
    kx, kp = jax.random.split(key)
    x = jax.random.normal(kx, (2, 4, 16, 16), jnp.float32)   # NCHW like PyTorch
    params = init_params(kp, options)

    fwd = jax.jit(functools.partial(resnet2_forward_pallas, options=options))
    out = jax.block_until_ready(fwd(x, params))

    ref = jax.block_until_ready(resnet2_forward_ref(x, params, options))
    assert out.shape == ref.shape, (out.shape, ref.shape)
    # Kernel uses bf16 MXU operands (f32 accumulation / BN / ReLU) vs the
    # all-f32 reference, hence the bf16-level tolerance.
    if not np.allclose(np.asarray(out), np.asarray(ref), rtol=1e-2, atol=1e-2):
        raise AssertionError("Pallas output mismatch vs reference")

    print("KERNEL_OK")
</pallas_src>

<mosaic_0001>
module attributes {stable_mosaic.version = 11 : i64} {
  func.func @_resnet2_block_kernel(%arg0: i32, %arg1: memref<2x4x256xf32, #tpu.memory_space<vmem>>, %arg2: memref<24x4xbf16, #tpu.memory_space<vmem>>, %arg3: memref<8x72xbf16, #tpu.memory_space<vmem>>, %arg4: memref<16x8xbf16, #tpu.memory_space<vmem>>, %arg5: memref<48x1xf32, #tpu.memory_space<vmem>>, %arg6: memref<9x512xf32, #tpu.memory_space<vmem>>, %arg7: memref<2x16x256xf32, #tpu.memory_space<vmem>>) attributes {dimension_semantics = [#tpu.dimension_semantics<parallel>], iteration_bounds = array<i64: 1>, scalar_prefetch = 0 : i64, scratch_operands = 0 : i64, tpu.core_type = #tpu.core_type<tc>, window_params = [{transform_indices = @transform_0, window_bounds = array<i64: 2, 4, 256>}, {pipeline_mode = #tpu.pipeline_mode<synchronous>, transform_indices = @transform_1, window_bounds = array<i64: 24, 4>}, {pipeline_mode = #tpu.pipeline_mode<synchronous>, transform_indices = @transform_2, window_bounds = array<i64: 8, 72>}, {pipeline_mode = #tpu.pipeline_mode<synchronous>, transform_indices = @transform_3, window_bounds = array<i64: 16, 8>}, {pipeline_mode = #tpu.pipeline_mode<synchronous>, transform_indices = @transform_4, window_bounds = array<i64: 48, 1>}, {pipeline_mode = #tpu.pipeline_mode<synchronous>, transform_indices = @transform_5, window_bounds = array<i64: 9, 512>}, {transform_indices = @transform_6, window_bounds = array<i64: 2, 16, 256>}]} {
    %c0 = arith.constant 0 : index
    %c0_0 = arith.constant 0 : index
    %c0_1 = arith.constant 0 : index
    %0 = vector.load %arg1[%c0, %c0_0, %c0_1] : memref<2x4x256xf32, #tpu.memory_space<vmem>>, vector<1x4x256xf32>
    %1 = vector.shape_cast %0 : vector<1x4x256xf32> to vector<4x256xf32>
    %c1 = arith.constant 1 : index
    %c0_2 = arith.constant 0 : index
    %c0_3 = arith.constant 0 : index
    %2 = vector.load %arg1[%c1, %c0_2, %c0_3] : memref<2x4x256xf32, #tpu.memory_space<vmem>>, vector<1x4x256xf32>
    %3 = vector.shape_cast %2 : vector<1x4x256xf32> to vector<4x256xf32>
    %4 = tpu.concatenate %1, %3 in 1 : vector<4x256xf32>, vector<4x256xf32> -> vector<4x512xf32>
    %5 = arith.truncf %4 : vector<4x512xf32> to vector<4x512xbf16>
    %c0_4 = arith.constant 0 : index
    %c0_5 = arith.constant 0 : index
    %6 = vector.load %arg2[%c0_4, %c0_5] : memref<24x4xbf16, #tpu.memory_space<vmem>>, vector<24x4xbf16>
    %cst = arith.constant dense<0.000000e+00> : vector<24x512xf32>
    %7 = tpu.matmul %6, %5, %cst {dimension_numbers = #tpu.dot_dimension_numbers<[1], [0], [0], [1], [0, 0, 1, 1], [], []>} : vector<24x4xbf16>, vector<4x512xbf16>, vector<24x512xf32> -> vector<24x512xf32>
    %8 = vector.extract_strided_slice %7 {offsets = [0, 0], sizes = [8, 512], strides = [1, 1]} : vector<24x512xf32> to vector<8x512xf32>
    %c0_6 = arith.constant 0 : index
    %c0_7 = arith.constant 0 : index
    %9 = vector.load %arg5[%c0_6, %c0_7] : memref<48x1xf32, #tpu.memory_space<vmem>>, vector<8x1xf32>
    %10 = vector.broadcast %9 : vector<8x1xf32> to vector<8x512xf32>
    %11 = arith.addf %8, %10 : vector<8x512xf32>
    %cst_8 = arith.constant 0.000000e+00 : f32
    %12 = vector.broadcast %cst_8 : f32 to vector<8x512xf32>
    %13 = arith.maximumf %11, %12 : vector<8x512xf32>
    %14 = vector.extract_strided_slice %7 {offsets = [8, 0], sizes = [16, 512], strides = [1, 1]} : vector<24x512xf32> to vector<16x512xf32>
    %c32 = arith.constant 32 : index
    %c0_9 = arith.constant 0 : index
    %15 = vector.load %arg5[%c32, %c0_9] : memref<48x1xf32, #tpu.memory_space<vmem>>, vector<16x1xf32>
    %16 = vector.broadcast %15 : vector<16x1xf32> to vector<16x512xf32>
    %17 = arith.addf %14, %16 : vector<16x512xf32>
    %cst_10 = arith.constant 0.000000e+00 : f32
    %18 = vector.broadcast %cst_10 : f32 to vector<16x512xf32>
    %19 = arith.maximumf %17, %18 : vector<16x512xf32>
    %c17_i32 = arith.constant 17 : i32
    %20 = tpu.dynamic_rotate %13 by %c17_i32 dim 1 : vector<8x512xf32>, i32 -> vector<8x512xf32>
    %c0_11 = arith.constant 0 : index
    %c0_12 = arith.constant 0 : index
    %21 = vector.load %arg6[%c0_11, %c0_12] : memref<9x512xf32, #tpu.memory_space<vmem>>, vector<1x512xf32>
    %22 = vector.broadcast %21 : vector<1x512xf32> to vector<8x512xf32>
    %23 = arith.mulf %20, %22 : vector<8x512xf32>
    %24 = arith.truncf %23 : vector<8x512xf32> to vector<8x512xbf16>
    %c16_i32 = arith.constant 16 : i32
    %25 = tpu.dynamic_rotate %13 by %c16_i32 dim 1 : vector<8x512xf32>, i32 -> vector<8x512xf32>
    %c1_13 = arith.constant 1 : index
    %c0_14 = arith.constant 0 : index
    %26 = vector.load %arg6[%c1_13, %c0_14] : memref<9x512xf32, #tpu.memory_space<vmem>>, vector<1x512xf32>
    %27 = vector.broadcast %26 : vector<1x512xf32> to vector<8x512xf32>
    %28 = arith.mulf %25, %27 : vector<8x512xf32>
    %29 = arith.truncf %28 : vector<8x512xf32> to vector<8x512xbf16>
    %c15_i32 = arith.constant 15 : i32
    %30 = tpu.dynamic_rotate %13 by %c15_i32 dim 1 : vector<8x512xf32>, i32 -> vector<8x512xf32>
    %c2 = arith.constant 2 : index
    %c0_15 = arith.constant 0 : index
    %31 = vector.load %arg6[%c2, %c0_15] : memref<9x512xf32, #tpu.memory_space<vmem>>, vector<1x512xf32>
    %32 = vector.broadcast %31 : vector<1x512xf32> to vector<8x512xf32>
    %33 = arith.mulf %30, %32 : vector<8x512xf32>
    %34 = arith.truncf %33 : vector<8x512xf32> to vector<8x512xbf16>
    %c1_i32 = arith.constant 1 : i32
    %35 = tpu.dynamic_rotate %13 by %c1_i32 dim 1 : vector<8x512xf32>, i32 -> vector<8x512xf32>
    %c3 = arith.constant 3 : index
    %c0_16 = arith.constant 0 : index
    %36 = vector.load %arg6[%c3, %c0_16] : memref<9x512xf32, #tpu.memory_space<vmem>>, vector<1x512xf32>
    %37 = vector.broadcast %36 : vector<1x512xf32> to vector<8x512xf32>
    %38 = arith.mulf %35, %37 : vector<8x512xf32>
    %39 = arith.truncf %38 : vector<8x512xf32> to vector<8x512xbf16>
    %40 = arith.truncf %13 : vector<8x512xf32> to vector<8x512xbf16>
    %c511_i32 = arith.constant 511 : i32
    %41 = tpu.dynamic_rotate %13 by %c511_i32 dim 1 : vector<8x512xf32>, i32 -> vector<8x512xf32>
    %c5 = arith.constant 5 : index
    %c0_17 = arith.constant 0 : index
    %42 = vector.load %arg6[%c5, %c0_17] : memref<9x512xf32, #tpu.memory_space<vmem>>, vector<1x512xf32>
    %43 = vector.broadcast %42 : vector<1x512xf32> to vector<8x512xf32>
    %44 = arith.mulf %41, %43 : vector<8x512xf32>
    %45 = arith.truncf %44 : vector<8x512xf32> to vector<8x512xbf16>
    %c497_i32 = arith.constant 497 : i32
    %46 = tpu.dynamic_rotate %13 by %c497_i32 dim 1 : vector<8x512xf32>, i32 -> vector<8x512xf32>
    %c6 = arith.constant 6 : index
    %c0_18 = arith.constant 0 : index
    %47 = vector.load %arg6[%c6, %c0_18] : memref<9x512xf32, #tpu.memory_space<vmem>>, vector<1x512xf32>
    %48 = vector.broadcast %47 : vector<1x512xf32> to vector<8x512xf32>
    %49 = arith.mulf %46, %48 : vector<8x512xf32>
    %50 = arith.truncf %49 : vector<8x512xf32> to vector<8x512xbf16>
    %c496_i32 = arith.constant 496 : i32
    %51 = tpu.dynamic_rotate %13 by %c496_i32 dim 1 : vector<8x512xf32>, i32 -> vector<8x512xf32>
    %c7 = arith.constant 7 : index
    %c0_19 = arith.constant 0 : index
    %52 = vector.load %arg6[%c7, %c0_19] : memref<9x512xf32, #tpu.memory_space<vmem>>, vector<1x512xf32>
    %53 = vector.broadcast %52 : vector<1x512xf32> to vector<8x512xf32>
    %54 = arith.mulf %51, %53 : vector<8x512xf32>
    %55 = arith.truncf %54 : vector<8x512xf32> to vector<8x512xbf16>
    %c495_i32 = arith.constant 495 : i32
    %56 = tpu.dynamic_rotate %13 by %c495_i32 dim 1 : vector<8x512xf32>, i32 -> vector<8x512xf32>
    %c8 = arith.constant 8 : index
    %c0_20 = arith.constant 0 : index
    %57 = vector.load %arg6[%c8, %c0_20] : memref<9x512xf32, #tpu.memory_space<vmem>>, vector<1x512xf32>
    %58 = vector.broadcast %57 : vector<1x512xf32> to vector<8x512xf32>
    %59 = arith.mulf %56, %58 : vector<8x512xf32>
    %60 = arith.truncf %59 : vector<8x512xf32> to vector<8x512xbf16>
    %61 = tpu.concatenate %24, %29, %34, %39, %40, %45, %50, %55, %60 in 0 : vector<8x512xbf16>, vector<8x512xbf16>, vector<8x512xbf16>, vector<8x512xbf16>, vector<8x512xbf16>, vector<8x512xbf16>, vector<8x512xbf16>, vector<8x512xbf16>, vector<8x512xbf16> -> vector<72x512xbf16>
    %c0_21 = arith.constant 0 : index
    %c0_22 = arith.constant 0 : index
    %62 = vector.load %arg3[%c0_21, %c0_22] : memref<8x72xbf16, #tpu.memory_space<vmem>>, vector<8x72xbf16>
    %cst_23 = arith.constant dense<0.000000e+00> : vector<8x512xf32>
    %63 = tpu.matmul %62, %61, %cst_23 {dimension_numbers = #tpu.dot_dimension_numbers<[1], [0], [0], [1], [0, 0, 1, 1], [], []>} : vector<8x72xbf16>, vector<72x512xbf16>, vector<8x512xf32> -> vector<8x512xf32>
    %c8_24 = arith.constant 8 : index
    %c0_25 = arith.constant 0 : index
    %64 = vector.load %arg5[%c8_24, %c0_25] : memref<48x1xf32, #tpu.memory_space<vmem>>, vector<8x1xf32>
    %65 = vector.broadcast %64 : vector<8x1xf32> to vector<8x512xf32>
    %66 = arith.addf %63, %65 : vector<8x512xf32>
    %cst_26 = arith.constant 0.000000e+00 : f32
    %67 = vector.broadcast %cst_26 : f32 to vector<8x512xf32>
    %68 = arith.maximumf %66, %67 : vector<8x512xf32>
    %c0_27 = arith.constant 0 : index
    %c0_28 = arith.constant 0 : index
    %69 = vector.load %arg4[%c0_27, %c0_28] : memref<16x8xbf16, #tpu.memory_space<vmem>>, vector<16x8xbf16>
    %70 = arith.truncf %68 : vector<8x512xf32> to vector<8x512xbf16>
    %cst_29 = arith.constant dense<0.000000e+00> : vector<16x512xf32>
    %71 = tpu.matmul %69, %70, %cst_29 {dimension_numbers = #tpu.dot_dimension_numbers<[1], [0], [0], [1], [0, 0, 1, 1], [], []>} : vector<16x8xbf16>, vector<8x512xbf16>, vector<16x512xf32> -> vector<16x512xf32>
    %c16 = arith.constant 16 : index
    %c0_30 = arith.constant 0 : index
    %72 = vector.load %arg5[%c16, %c0_30] : memref<48x1xf32, #tpu.memory_space<vmem>>, vector<16x1xf32>
    %73 = vector.broadcast %72 : vector<16x1xf32> to vector<16x512xf32>
    %74 = arith.addf %71, %73 : vector<16x512xf32>
    %cst_31 = arith.constant 0.000000e+00 : f32
    %75 = vector.broadcast %cst_31 : f32 to vector<16x512xf32>
    %76 = arith.maximumf %74, %75 : vector<16x512xf32>
    %77 = arith.addf %76, %19 : vector<16x512xf32>
    %cst_32 = arith.constant 0.000000e+00 : f32
    %78 = vector.broadcast %cst_32 : f32 to vector<16x512xf32>
    %79 = arith.maximumf %77, %78 : vector<16x512xf32>
    %80 = vector.extract_strided_slice %79 {offsets = [0, 0], sizes = [16, 256], strides = [1, 1]} : vector<16x512xf32> to vector<16x256xf32>
    %c0_33 = arith.constant 0 : index
    %c0_34 = arith.constant 0 : index
    %c0_35 = arith.constant 0 : index
    %81 = vector.load %arg7[%c0_33, %c0_34, %c0_35] : memref<2x16x256xf32, #tpu.memory_space<vmem>>, vector<1x16x256xf32>
    %82 = vector.shape_cast %81 : vector<1x16x256xf32> to vector<16x256xf32>
    %83 = vector.shape_cast %80 : vector<16x256xf32> to vector<1x16x256xf32>
    tpu.vector_store %arg7[%c0_33, %c0_34, %c0_35], %83 {strides = array<i32>} : memref<2x16x256xf32, #tpu.memory_space<vmem>>, vector<1x16x256xf32>,
    %84 = vector.extract_strided_slice %79 {offsets = [0, 256], sizes = [16, 256], strides = [1, 1]} : vector<16x512xf32> to vector<16x256xf32>
    %c1_36 = arith.constant 1 : index
    %c0_37 = arith.constant 0 : index
    %c0_38 = arith.constant 0 : index
    %85 = vector.load %arg7[%c1_36, %c0_37, %c0_38] : memref<2x16x256xf32, #tpu.memory_space<vmem>>, vector<1x16x256xf32>
    %86 = vector.shape_cast %85 : vector<1x16x256xf32> to vector<16x256xf32>
    %87 = vector.shape_cast %84 : vector<16x256xf32> to vector<1x16x256xf32>
    tpu.vector_store %arg7[%c1_36, %c0_37, %c0_38], %87 {strides = array<i32>} : memref<2x16x256xf32, #tpu.memory_space<vmem>>, vector<1x16x256xf32>,
    return
  }
  func.func @transform_0(%arg0: i32) -> (i32, i32, i32) {
    %c0_i32 = arith.constant 0 : i32
    %c0_i32_0 = arith.constant 0 : i32
    %c0_i32_1 = arith.constant 0 : i32
    return %arg0, %c0_i32, %c0_i32_0 : i32, i32, i32
  }
  func.func @transform_1(%arg0: i32) -> (i32, i32) {
    %c0_i32 = arith.constant 0 : i32
    %c0_i32_0 = arith.constant 0 : i32
    %c0_i32_1 = arith.constant 0 : i32
    return %c0_i32, %c0_i32_0 : i32, i32
  }
  func.func @transform_2(%arg0: i32) -> (i32, i32) {
    %c0_i32 = arith.constant 0 : i32
    %c0_i32_0 = arith.constant 0 : i32
    %c0_i32_1 = arith.constant 0 : i32
    return %c0_i32, %c0_i32_0 : i32, i32
  }
  func.func @transform_3(%arg0: i32) -> (i32, i32) {
    %c0_i32 = arith.constant 0 : i32
    %c0_i32_0 = arith.constant 0 : i32
    %c0_i32_1 = arith.constant 0 : i32
    return %c0_i32, %c0_i32_0 : i32, i32
  }
  func.func @transform_4(%arg0: i32) -> (i32, i32) {
    %c0_i32 = arith.constant 0 : i32
    %c0_i32_0 = arith.constant 0 : i32
    %c0_i32_1 = arith.constant 0 : i32
    return %c0_i32, %c0_i32_0 : i32, i32
  }
  func.func @transform_5(%arg0: i32) -> (i32, i32) {
    %c0_i32 = arith.constant 0 : i32
    %c0_i32_0 = arith.constant 0 : i32
    %c0_i32_1 = arith.constant 0 : i32
    return %c0_i32, %c0_i32_0 : i32, i32
  }
  func.func @transform_6(%arg0: i32) -> (i32, i32, i32) {
    %c0_i32 = arith.constant 0 : i32
    %c0_i32_0 = arith.constant 0 : i32
    %c0_i32_1 = arith.constant 0 : i32
    return %arg0, %c0_i32, %c0_i32_0 : i32, i32, i32
  }
}

</mosaic_0001>

<bundles_post_ra>
// kernel: resnet2_forward_pallas.1
= control target key start
LH: loop header
LB: loop body
LE: loop exit
PB: predicated region body
PF: predicated region fallthrough
CT: control target
= control target key end

     0   :  { %vm55_vm0 = vcmask 1041408   ;;  %v1475_v2 = vmov 0   ;;  %vm48_vm1 = vcmask 31744   ;;  %s983_s28 = smov 16   ;;  %s984_s29 = smov 17   ;;  %v220_v36 = vlaneseq  ;;  %s1468_s0 = inlined_call_operand.vmem [shape: f32[2,4,256], index: 0, kind: input, shape index: {}]   ;;  %s1469_s1 = inlined_call_operand.vmem [shape: bf16[24,4], index: 1, kind: input, shape index: {}]   ;;  %s1470_s4 = inlined_call_operand.vmem [shape: f32[48,1], index: 4, kind: input, shape index: {}]   ;;  %s1471_s5 = inlined_call_operand.vmem [shape: f32[9,512], index: 5, kind: input, shape index: {}]   ;;  %s1472_s2 = inlined_call_operand.vmem [shape: bf16[8,72], index: 2, kind: input, shape index: {}]   ;;  %s1473_s3 = inlined_call_operand.vmem [shape: bf16[16,8], index: 3, kind: input, shape index: {}]   ;;  %s1474_s6 = inlined_call_operand.vmem [shape: f32[2,16,256], index: 6, kind: output, shape index: {}]  }
   0x1   :  { %v24_v0 = vld [vmem:[%s1468_s0] sm:$0xff]  ;;  %v937_v1 = vld [vmem:[%s1468_s0 + $0x8] sm:$0xff]  ;;  %100 = vmatprep.mubr.bf16.mxu0 %v1475_v2  ;;  %151 = vmatprep.mubr.bf16.mxu1 %v1475_v2  ;;  %s985_s30 = smov 1   ;;  %s986_s7 = smov 15   ;;  %v781_v32 = vld [vmem:[%s1470_s4 + $0x10] sm:$0xff]  ;;  %vm601_vm4 = vcmask 1043456  }
   0x2   :  { %v28_v3 = vcombine.high %v24_v0, %v24_v0  ;;  %v31_v4 = vcombine.high %v937_v1, %v937_v1  ;;  %v33_v5 = vpack.c.bf16 %v24_v0, %v24_v0  ;;  %v35_v6 = vpack.c.bf16 %v937_v1, %v937_v1  ;;  %975 = vset.pattern.permute.xlu0 %v1475_v2  ;;  %v170_v7 = vld [vmem:[%s1470_s4] sm:$0xff]  ;;  %s987_s8 = smov 127   ;;  %s988_s9 = smov 112   ;;  %v980_v30 = vld [vmem:[%s1469_s1 + $0x8] ss:$0 sps:$4 sm:$0xff]   ;;  %v782_v35 = vld [vmem:[%s1470_s4 + $0x18] sm:$0xff] }
   0x3   :  { %173 = vperm.xlu0 %975, %v170_v7   ;;  %976 = vset.pattern.permute.xlu1 %v1475_v2  ;;  %v979_v12 = vld [vmem:[%s1469_s1] sm:$0xff]   ;;  %s989_s12 = smov 113   ;;  %s990_s13 = smov 111   ;;  %v667_v33 = vld [vmem:[%s1470_s4 + $0x8] sm:$0xff]  ;;  %v230_v37 = vshrl.u32 %v220_v36, 7  ;;  %v1124_v38 = vand.u32 127, %v220_v36 }
   0x4   :  { %v34_v8 = vpack.c.bf16 %v28_v3, %v28_v3  ;;  %v36_v9 = vpack.c.bf16 %v31_v4, %v31_v4  ;;  %v57_v10 = vsel %vm55_vm0, %v33_v5, 0  ;;  %v63_v11 = vsel %vm55_vm0, %v35_v6, 0  ;;  %v184_v31 = vld [vmem:[%s1470_s4 + $0x20] sm:$0xff]  ;;  %v185_v34 = vld [vmem:[%s1470_s4 + $0x28] sm:$0xff] }
   0x5   :  { %v1130_v41 = vsub.s32 3, %v230_v37  ;;  %v1135_v42 = vld [vmem:[%s1471_s5 + $0x1] ss:$8 sm:$0xf]  ;;  %vm265_vm2 = vcmp.lt.s32.totalorder %v1124_v38, 16  ;;  %vm222_vm3 = vcmp.lt.s32.totalorder %v1124_v38, 17 }
   0x6   :  { %940 = vmatprep.subr.msk.bf16.mxu0 %vm55_vm0, %v34_v8  ;;  %943 = vmatprep.subr.msk.bf16.mxu1 %vm55_vm0, %v36_v9  ;;  %v1152_v50 = vld [vmem:[%s1471_s5] ss:$8 sm:$0xf]  ;;  %v1160_v61 = vsub.s32 0, %v230_v37  ;;  %v1162_v62 = vsub.s32 1, %v230_v37  ;;  %v1164_v63 = vsub.s32 2, %v230_v37 }
   0x7   :  { %69 = vmatpush1.bf16.msra.mxu0 %v57_v10  ;;  %120 = vmatpush1.bf16.msra.mxu1 %v63_v11  ;;  %v288_v44 = vrot.slane %v1135_v42, %v1130_v41  ;;  %v244_v51 = vrot.slane %v1152_v50, %v1130_v41  ;;  %v948_v4 = vld [vmem:[%s1471_s5 + $0x3] ss:$8 sm:$0xf]  ;;  %v1183_v9 = vld [vmem:[%s1471_s5 + $0x2] ss:$8 sm:$0xf] }
   0x8   :  { %v276_v5 = vrot.slane %v1135_v42, %v1160_v61  ;;  %v236_v6 = vrot.slane %v1152_v50, %v1162_v62  ;;  %v240_v7 = vrot.slane %v1152_v50, %v1164_v63  ;;  %v232_v8 = vrot.slane %v1152_v50, %v1160_v61 }
   0x9   :  { %vm353_vm5 = vcmp.lt.s32.totalorder %v1124_v38, 1  ;;  %vm309_vm6 = vcmp.lt.s32.totalorder %v1124_v38, 15  ;;  %vm401_vm7 = vcmp.lt.s32.totalorder %v1124_v38, 127  ;;  %vm489_vm8 = vcmp.lt.s32.totalorder %v1124_v38, 112 }
   0xa   :  { %941 = vmatmul.mubr.msk.bf16.vlgmr.msra.gmra.mrb[0].mxu0 %vm48_vm1, %v979_v12  ;;  %944 = vmatmul.mubr.msk.bf16.vlgmr.msra.gmra.mrb[0].mxu1 %vm48_vm1, %v979_v12  ;;  %vm445_vm9 = vcmp.lt.s32.totalorder %v1124_v38, 113  ;;  %vm533_vm10 = vcmp.lt.s32.totalorder %v1124_v38, 111  ;;  %vm673_vm11 = vcmask 588800   ;;  %vm798_vm12 = vcmask 64512  }
   0xb   :  { %110 = vmatprep.mubr.bf16.mxu0 %v1475_v2  ;;  %161 = vmatprep.mubr.bf16.mxu1 %v1475_v2 }
  0x12   :  { %942 = vmatmul.mubr.msk.bf16.gmra.mrb[4].mxu0 %vm48_vm1, %v980_v30  ;;  %945 = vmatmul.mubr.msk.bf16.gmra.mrb[4].mxu1 %vm48_vm1, %v980_v30  ;;  %v1212_v30 = vld [vmem:[%s1471_s5 + $0x7] ss:$8 sm:$0xf] }
  0x13   :  { %721 = vmatprep.mubr.bf16.mxu0 %v1475_v2  ;;  %762 = vmatprep.mubr.bf16.mxu1 %v1475_v2  ;;  %v504_v12 = vrot.slane %v1212_v30, %v1162_v62 }
  0x82   :  { %v174_v13 = vpop.permute.xlu0 %173 }
  0xdd   :  { %v102_v14 = vpop.f32.mrb[0].mxu0  ;;  %v153_v15 = vpop.f32.mrb[0].mxu1 }
  0xde   :  { %v176_v16 = vadd.f32 %v174_v13, %v102_v14  ;;  %v178_v17 = vadd.f32 %v174_v13, %v153_v15  ;;  %v104_v18 = vpop.f32.mrb[1].mxu0  ;;  %v155_v19 = vpop.f32.mrb[1].mxu1  ;;  %v368_v14 = vrot.slane %v948_v4, %v1162_v62 }
  0xdf   :  { %v1050_v20 = vpop.f32.mrb[2].mxu0  ;;  %v1052_v21 = vpop.f32.mrb[2].mxu1  ;;  %v179_v24 = vadd.f32 %v174_v13, %v155_v19  ;;  %v177_v27 = vadd.f32 %v174_v13, %v104_v18  ;;  %v372_v19 = vrot.slane %v948_v4, %v1164_v63 }
  0xe0   :  { %v1054_v22 = vmax.f32 %v176_v16, 0.0  ;;  %v1056_v23 = vmax.f32 %v178_v17, 0.0  ;;  %v1058_v25 = vpop.f32.mrb[3].mxu0  ;;  %v1060_v26 = vpop.f32.mrb[3].mxu1 }
  0xe1   :  { %v1066_v28 = vmax.f32 %v179_v24, 0.0  ;;  %v1071_v29 = vmax.f32 %v177_v27, 0.0  ;;  %v1201_v17 = vld [vmem:[%s1471_s5 + $0x5] ss:$8 sm:$0xf]  ;;  %v364_v24 = vrot.slane %v948_v4, %v1160_v61  ;;  %v376_v27 = vrot.slane %v948_v4, %v1130_v41 }
  0xe2   :  { %261 = vrot.lane.b32.xlu1 %v1056_v23, %s983_s28  ;;  %257 = vrot.lane.b32.xlu0 %v1054_v22, %s983_s28  ;;  %v412_v37 = vrot.slane %v1201_v17, %v1160_v61  ;;  %v424_v50 = vrot.slane %v1201_v17, %v1130_v41  ;;  %v512_v4 = vrot.slane %v1212_v30, %v1130_v41 }
  0xe6   :  { %212 = vrot.lane.b32.xlu1 %v1054_v22, %s984_s29  ;;  %263 = vrot.lane.b32.xlu0 %v1066_v28, %s983_s28 }
  0xea   :  { %216 = vrot.lane.b32.xlu1 %v1056_v23, %s984_s29  ;;  %214 = vrot.lane.b32.xlu0 %v1071_v29, %s984_s29 }
  0xee   :  { %345 = vrot.lane.b32.xlu1 %v1054_v22, %s985_s30  ;;  %218 = vrot.lane.b32.xlu0 %v1066_v28, %s984_s29 }
  0xf2   :  { %349 = vrot.lane.b32.xlu1 %v1056_v23, %s985_s30  ;;  %347 = vrot.lane.b32.xlu0 %v1071_v29, %s985_s30 }
  0xf6   :  { %301 = vrot.lane.b32.xlu1 %v1054_v22, %s986_s7  ;;  %351 = vrot.lane.b32.xlu0 %v1066_v28, %s985_s30 }
  0xfa   :  { %305 = vrot.lane.b32.xlu1 %v1056_v23, %s986_s7  ;;  %303 = vrot.lane.b32.xlu0 %v1071_v29, %s986_s7 }
  0xfe   :  { %393 = vrot.lane.b32.xlu1 %v1054_v22, %s987_s8  ;;  %307 = vrot.lane.b32.xlu0 %v1066_v28, %s986_s7 }
 0x102   :  { %397 = vrot.lane.b32.xlu1 %v1056_v23, %s987_s8  ;;  %395 = vrot.lane.b32.xlu0 %v1071_v29, %s987_s8 }
 0x106   :  { %481 = vrot.lane.b32.xlu1 %v1054_v22, %s988_s9  ;;  %399 = vrot.lane.b32.xlu0 %v1066_v28, %s987_s8 }
 0x10a   :  { %483 = vrot.lane.b32.xlu0 %v1071_v29, %s988_s9  ;;  %259 = vrot.lane.b32.xlu1 %v1071_v29, %s983_s28 }
 0x10e   :  { %487 = vrot.lane.b32.xlu0 %v1066_v28, %s988_s9  ;;  %485 = vrot.lane.b32.xlu1 %v1056_v23, %s988_s9 }
 0x112   :  { %439 = vrot.lane.b32.xlu0 %v1071_v29, %s989_s12  ;;  %437 = vrot.lane.b32.xlu1 %v1054_v22, %s989_s12 }
 0x116   :  { %443 = vrot.lane.b32.xlu0 %v1066_v28, %s989_s12  ;;  %441 = vrot.lane.b32.xlu1 %v1056_v23, %s989_s12 }
 0x11a   :  { %527 = vrot.lane.b32.xlu0 %v1071_v29, %s990_s13  ;;  %525 = vrot.lane.b32.xlu1 %v1054_v22, %s990_s13 }
 0x11e   :  { %531 = vrot.lane.b32.xlu0 %v1066_v28, %s990_s13  ;;  %529 = vrot.lane.b32.xlu1 %v1056_v23, %s990_s13 }
 0x122   :  { %188 = vperm.xlu0 %975, %v184_v31   ;;  %670 = vperm.xlu1 %976, %v667_v33   ;;  %v324_v31 = vrot.slane %v1183_v9, %v1162_v62  ;;  %v320_v33 = vrot.slane %v1183_v9, %v1160_v61 }
 0x126   :  { %785 = vperm.xlu0 %975, %v781_v32   ;;  %193 = vperm.xlu1 %976, %v185_v34   ;;  %v328_v32 = vrot.slane %v1183_v9, %v1164_v63  ;;  %v332_v34 = vrot.slane %v1183_v9, %v1130_v41 }
 0x12a   :  { %790 = vperm.xlu1 %976, %v782_v35  }
 0x154   :  { %v1126_v39 = vpop.permute.xlu1 %261  ;;  %v1128_v40 = vpop.permute.xlu0 %257 }
 0x158   :  { %v1138_v43 = vpop.permute.xlu1 %212  ;;  %v264_v45 = vpop.permute.xlu0 %263 }
 0x159   :  { %v266_v46 = vsel %vm265_vm2, %v1126_v39, %v264_v45  ;;  %v269_v13 = vsel %vm265_vm2, %v264_v45, %v1128_v40 }
 0x15a   :  { %v296_v47 = vmul.f32 %v288_v44, %v266_v46  ;;  %v293_v35 = vmul.f32 %v276_v5, %v269_v13  ;;  %v416_v46 = vrot.slane %v1201_v17, %v1162_v62 }
 0x15c   :  { %v1145_v48 = vpop.permute.xlu1 %216  ;;  %v1147_v49 = vpop.permute.xlu0 %214  ;;  %v300_v52 = vpack.c.bf16 %v296_v47, %v296_v47  ;;  %v420_v47 = vrot.slane %v1201_v17, %v1164_v63  ;;  %v297_v5 = vpack.c.bf16 %v293_v35, %v293_v35 }
 0x15d   :  { %v224_v13 = vsel %vm222_vm3, %v1147_v49, %v1145_v48 }
 0x15e   :  { %v576_v57 = vrot.slane %v300_v52, 4  ;;  %v573_v35 = vrot.slane %v297_v5, 4 }
 0x160   :  { %v346_v53 = vpop.permute.xlu1 %345  ;;  %v219_v54 = vpop.permute.xlu0 %218 }
 0x161   :  { %v223_v55 = vsel %vm222_vm3, %v1145_v48, %v219_v54  ;;  %v226_v36 = vsel %vm222_vm3, %v219_v54, %v1138_v43  ;;  %v1272_v48 = vld [vmem:[%s1471_s5 + $0x20] ss:$8 sm:$0xf] }
 0x162   :  { %v252_v56 = vmul.f32 %v244_v51, %v223_v55  ;;  %v280_v55 = vrot.slane %v1135_v42, %v1162_v62 }
 0x164   :  { %v256_v58 = vpack.c.bf16 %v252_v56, %v252_v56  ;;  %v350_v59 = vpop.permute.xlu1 %349  ;;  %v348_v60 = vpop.permute.xlu0 %347  ;;  %v284_v56 = vrot.slane %v1135_v42, %v1164_v63 }
 0x165   :  { %v355_v52 = vsel %vm353_vm5, %v348_v60, %v350_v59  ;;  %v356_v54 = vsel %vm353_vm5, %v346_v53, %v348_v60 }
 0x166   :  { %v616_v0 = vsel %vm601_vm4, %v256_v58, %v576_v57  ;;  %v1247_v57 = vld [vmem:[%s1471_s5 + $0x6] ss:$8 sm:$0xf]  ;;  %v225_v58 = vsel %vm222_vm3, %v1138_v43, %v1147_v49  ;;  %v382_v43 = vmul.f32 %v368_v14, %v356_v54 }
 0x167   :  { %730 = vmatprep.subr.bf16.mxu1 %v616_v0  ;;  %v249_v0 = vmul.f32 %v232_v8, %v226_v36  ;;  %v383_v8 = vmul.f32 %v372_v19, %v355_v52  ;;  %v1274_v49 = vmul.f32 %v236_v6, %v225_v58  ;;  %v1280_v19 = vmul.f32 %v240_v7, %v224_v13 }
 0x168   :  { %v1167_v1 = vpop.permute.xlu1 %301  ;;  %v352_v3 = vpop.permute.xlu0 %351  ;;  %v386_v7 = vpack.c.bf16 %v382_v43, %v382_v43 }
 0x169   :  { %v357_v60 = vsel %vm353_vm5, %v352_v3, %v346_v53  ;;  %v354_v2 = vsel %vm353_vm5, %v350_v59, %v352_v3  ;;  %v253_v52 = vpack.c.bf16 %v249_v0, %v249_v0  ;;  %v254_v13 = vpack.c.bf16 %v1274_v49, %v1274_v49 }
 0x16a   :  { %v381_v59 = vmul.f32 %v364_v24, %v357_v60  ;;  %v384_v54 = vmul.f32 %v376_v27, %v354_v2  ;;  %v387_v60 = vpack.c.bf16 %v383_v8, %v383_v8  ;;  %v255_v8 = vpack.c.bf16 %v1280_v19, %v1280_v19 }
 0x16b   :  { %v604_v14 = vsel %vm601_vm4, %v253_v52, %v573_v35  ;;  %v582_v18 = vrot.slane %v386_v7, 4 }
 0x16c   :  { %v1196_v15 = vpop.permute.xlu1 %305  ;;  %v304_v16 = vpop.permute.xlu0 %303  ;;  %v385_v10 = vpack.c.bf16 %v381_v59, %v381_v59  ;;  %v583_v53 = vrot.slane %v387_v60, 4 }
 0x16d   :  { %v312_v6 = vsel %vm309_vm6, %v1167_v1, %v304_v16  ;;  %v311_v2 = vsel %vm309_vm6, %v304_v16, %v1196_v15  ;;  %v388_v16 = vpack.c.bf16 %v384_v54, %v384_v54 }
 0x16e   :  { %v338_v58 = vmul.f32 %v324_v31, %v312_v6  ;;  %v339_v3 = vmul.f32 %v328_v32, %v311_v2  ;;  %v581_v51 = vrot.slane %v385_v10, 4 }
 0x170   :  { %v394_v44 = vpop.permute.xlu1 %393  ;;  %v308_v45 = vpop.permute.xlu0 %307 }
 0x171   :  { %v313_v24 = vsel %vm309_vm6, %v308_v45, %v1167_v1  ;;  %v310_v49 = vsel %vm309_vm6, %v1196_v15, %v308_v45 }
 0x172   :  { %v337_v19 = vmul.f32 %v320_v33, %v313_v24  ;;  %v340_v33 = vmul.f32 %v332_v34, %v310_v49 }
 0x174   :  { %v398_v36 = vpop.permute.xlu1 %397  ;;  %v396_v11 = vpop.permute.xlu0 %395 }
 0x175   :  { %v403_v27 = vsel %vm401_vm7, %v396_v11, %v398_v36  ;;  %v404_v1 = vsel %vm401_vm7, %v394_v44, %v396_v11 }
 0x176   :  { %v430_v59 = vmul.f32 %v416_v46, %v403_v27  ;;  %v429_v10 = vmul.f32 %v412_v37, %v404_v1  ;;  %v342_v46 = vpack.c.bf16 %v338_v58, %v338_v58 }
 0x178   :  { %v482_v0 = vpop.permute.xlu1 %481  ;;  %v400_v5 = vpop.permute.xlu0 %399  ;;  %v433_v58 = vpack.c.bf16 %v429_v10, %v429_v10 }
 0x179   :  { %v405_v43 = vsel %vm401_vm7, %v400_v5, %v394_v44  ;;  %v402_v32 = vsel %vm401_vm7, %v398_v36, %v400_v5  ;;  %v584_v44 = vrot.slane %v388_v16, 4  ;;  %v341_v36 = vpack.c.bf16 %v337_v19, %v337_v19 }
 0x17a   :  { %v432_v31 = vmul.f32 %v424_v50, %v405_v43  ;;  %v343_v50 = vpack.c.bf16 %v339_v3, %v339_v3  ;;  %v431_v9 = vmul.f32 %v420_v47, %v402_v32  ;;  %v1477_v43 = vrot.slane %v1212_v30, %v1160_v61 }
 0x17b   :  { %v1478_v19 = vrot.slane %v1212_v30, %v1164_v63 }
 0x17c   :  { %v484_v54 = vpop.permute.xlu0 %483  ;;  %v260_v6 = vpop.permute.xlu1 %259  ;;  %v436_v34 = vpack.c.bf16 %v432_v31, %v432_v31  ;;  %v628_v32 = vsel %vm601_vm4, %v343_v50, %v583_v53 }
 0x17d   :  { %v267_v15 = vsel %vm265_vm2, %v260_v6, %v1126_v39  ;;  %v268_v11 = vsel %vm265_vm2, %v1128_v40, %v260_v6  ;;  %v434_v39 = vpack.c.bf16 %v430_v59, %v430_v59  ;;  %v492_v24 = vsel %vm489_vm8, %v482_v0, %v484_v54 }
 0x17e   :  { %v294_v45 = vmul.f32 %v280_v55, %v268_v11  ;;  %v295_v40 = vmul.f32 %v284_v56, %v267_v15  ;;  %v344_v56 = vpack.c.bf16 %v340_v33, %v340_v33  ;;  %v592_v5 = vrot.slane %v436_v34, 4 }
 0x17f   :  { %v590_v47 = vrot.slane %v434_v39, 4  ;;  %v517_v16 = vmul.f32 %v1477_v43, %v492_v24  ;;  %v589_v15 = vrot.slane %v433_v58, 4  ;;  %v1479_v33 = vpack.c.bf16 %v1071_v29, %v1071_v29 }
 0x180   :  { %v298_v35 = vpack.c.bf16 %v294_v45, %v294_v45  ;;  %v488_v52 = vpop.permute.xlu0 %487  ;;  %v486_v37 = vpop.permute.xlu1 %485  ;;  %v299_v55 = vpack.c.bf16 %v295_v40, %v295_v40  ;;  %v632_v6 = vsel %vm601_vm4, %v344_v56, %v584_v44  ;;  %v1483_v34 = vrot.slane %v1247_v57, %v1162_v62 }
 0x181   :  { %v493_v3 = vsel %vm489_vm8, %v488_v52, %v482_v0  ;;  %v491_v42 = vsel %vm489_vm8, %v484_v54, %v486_v37  ;;  %v490_v17 = vsel %vm489_vm8, %v486_v37, %v488_v52  ;;  %v435_v0 = vpack.c.bf16 %v431_v9, %v431_v9 }
 0x182   :  { %v574_v7 = vrot.slane %v298_v35, 4  ;;  %v575_v60 = vrot.slane %v299_v55, 4  ;;  %v520_v2 = vmul.f32 %v512_v4, %v493_v3  ;;  %v518_v27 = vmul.f32 %v504_v12, %v491_v42 }
 0x183   :  { %v519_v31 = vmul.f32 %v1478_v19, %v490_v17  ;;  %v624_v54 = vsel %vm601_vm4, %v342_v46, %v582_v18  ;;  %v591_v10 = vrot.slane %v435_v0, 4  ;;  %v521_v18 = vpack.c.bf16 %v517_v16, %v517_v16 }
 0x184   :  { %v440_v49 = vpop.permute.xlu0 %439  ;;  %v438_v1 = vpop.permute.xlu1 %437  ;;  %v608_v59 = vsel %vm601_vm4, %v254_v13, %v574_v7  ;;  %v612_v12 = vsel %vm601_vm4, %v255_v8, %v575_v60  ;;  %v620_v13 = vsel %vm601_vm4, %v341_v36, %v581_v51  ;;  %v524_v11 = vpack.c.bf16 %v520_v2, %v520_v2 }
 0x185   :  { %v448_v4 = vsel %vm445_vm9, %v438_v1, %v440_v49  ;;  %689 = vmatprep.subr.bf16.mxu0 %v608_v59  ;;  %731 = vmatpush1.bf16.msra.mxu1 %v612_v12  ;;  %v522_v30 = vpack.c.bf16 %v518_v27, %v518_v27  ;;  %v640_v8 = vsel %vm601_vm4, %v1479_v33, %v590_v47  ;;  %v597_v47 = vrot.slane %v521_v18, 4  ;;  %v112_v33 = vpop.f32.mrb[4].mxu0 }
 0x186   :  { %690 = vmatpush1.bf16.msra.mxu0 %v604_v14  ;;  %732 = vmatprep.subr.bf16.mxu1 %v632_v6  ;;  %v1480_v14 = vrot.slane %v1247_v57, %v1160_v61  ;;  %v1481_v51 = vpack.c.bf16 %v1066_v28, %v1066_v28  ;;  %v523_v50 = vpack.c.bf16 %v519_v31, %v519_v31  ;;  %v600_v37 = vrot.slane %v524_v11, 4 }
 0x187   :  { %691 = vmatprep.subr.bf16.mxu0 %v624_v54  ;;  %v1482_v36 = vrot.slane %v1247_v57, %v1130_v41  ;;  %v1484_v35 = vrot.slane %v1247_v57, %v1164_v63  ;;  %v598_v24 = vrot.slane %v522_v30, 4  ;;  %v548_v55 = vrot.slane %v1272_v48, %v1162_v62 }
 0x188   :  { %v473_v44 = vmul.f32 %v1480_v14, %v448_v4  ;;  %v444_v45 = vpop.permute.xlu0 %443  ;;  %v442_v53 = vpop.permute.xlu1 %441  ;;  %v648_v46 = vsel %vm601_vm4, %v1481_v51, %v592_v5  ;;  %v552_v3 = vrot.slane %v1272_v48, %v1164_v63  ;;  %v1485_v2 = vpack.c.bf16 %v1056_v23, %v1056_v23 }
 0x189   :  { %v449_v39 = vsel %vm445_vm9, %v444_v45, %v438_v1  ;;  %v446_v29 = vsel %vm445_vm9, %v442_v53, %v444_v45  ;;  %v447_v40 = vsel %vm445_vm9, %v440_v49, %v442_v53  ;;  %733 = vmatpush1.bf16.msra.mxu1 %v628_v32  ;;  %v1486_v62 = vpack.c.bf16 %v1054_v22, %v1054_v22 }
 0x18a   :  { %v476_v9 = vmul.f32 %v1482_v36, %v449_v39  ;;  %v474_v28 = vmul.f32 %v1483_v34, %v447_v40  ;;  %v475_v52 = vmul.f32 %v1484_v35, %v446_v29  ;;  %692 = vmatpush1.bf16.msra.mxu0 %v620_v13  ;;  %734 = vmatprep.subr.bf16.mxu1 %v648_v46  ;;  %v599_v0 = vrot.slane %v523_v50, 4 }
 0x18b   :  { %693 = vmatprep.subr.bf16.mxu0 %v640_v8  ;;  %v477_v42 = vpack.c.bf16 %v473_v44, %v473_v44  ;;  %v644_v27 = vsel %vm601_vm4, %v1485_v2, %v591_v10  ;;  %v636_v63 = vsel %vm601_vm4, %v1486_v62, %v589_v15  ;;  %v1487_v5 = vrot.slane %v1272_v48, %v1160_v61  ;;  %v163_v8 = vpop.f32.mrb[4].mxu1  ;;  %v114_v10 = vpop.f32.mrb[5].mxu0 }
 0x18c   :  { %v480_v56 = vpack.c.bf16 %v476_v9, %v476_v9  ;;  %v478_v58 = vpack.c.bf16 %v474_v28, %v474_v28  ;;  %v479_v7 = vpack.c.bf16 %v475_v52, %v475_v52  ;;  %v528_v57 = vpop.permute.xlu0 %527  ;;  %v526_v17 = vpop.permute.xlu1 %525  ;;  %v1488_v12 = vrot.slane %v1272_v48, %v1130_v41  ;;  %v666_v41 = vld [vmem:[%s1472_s2] sm:$0xf] }
 0x18d   :  { %v536_v60 = vsel %vm533_vm10, %v526_v17, %v528_v57  ;;  %735 = vmatpush1.bf16.msra.mxu1 %v644_v27  ;;  %v652_v22 = vsel %vm601_vm4, %v477_v42, %v597_v47  ;;  %v1489_v48 = vmov 0   ;;  %v165_v18 = vpop.f32.mrb[5].mxu1  ;;  %v116_v14 = vpop.f32.mrb[6].mxu0 }
 0x18e   :  { %v561_v43 = vmul.f32 %v1487_v5, %v536_v60  ;;  %694 = vmatpush1.bf16.msra.mxu0 %v636_v63  ;;  %v656_v16 = vsel %vm601_vm4, %v478_v58, %v598_v24  ;;  %v664_v49 = vsel %vm601_vm4, %v480_v56, %v600_v37  ;;  %v660_v59 = vsel %vm601_vm4, %v479_v7, %v599_v0  ;;  %v167_v44 = vpop.f32.mrb[6].mxu1  ;;  %v117_v53 = vpop.f32.mrb[7].mxu0  ;;  %v981_v60 = vld [vmem:[%s1473_s3] sm:$0xff]  }
 0x18f   :  { %695 = vmatprep.subr.bf16.mxu0 %v656_v16  ;;  %736 = vmatprep.subr.bf16.mxu1 %v664_v49  ;;  %v168_v45 = vpop.f32.mrb[7].mxu1 }
 0x190   :  { %v532_v23 = vpop.permute.xlu0 %531  ;;  %v530_v1 = vpop.permute.xlu1 %529  ;;  %v565_v19 = vpack.c.bf16 %v561_v43, %v561_v43 }
 0x191   :  { %v537_v31 = vsel %vm533_vm10, %v532_v23, %v526_v17  ;;  %v534_v61 = vsel %vm533_vm10, %v530_v1, %v532_v23  ;;  %v535_v4 = vsel %vm533_vm10, %v528_v57, %v530_v1  ;;  %737 = vmatpush1.bf16.msra.mxu1 %v660_v59 }
 0x192   :  { %v564_v54 = vmul.f32 %v1488_v12, %v537_v31  ;;  %v562_v6 = vmul.f32 %v548_v55, %v535_v4  ;;  %v563_v32 = vmul.f32 %v552_v3, %v534_v61  ;;  %696 = vmatpush1.bf16.msra.mxu0 %v652_v22  ;;  %v678_v30 = vsel %vm601_vm4, %v565_v19, 0 }
 0x194   :  { %v568_v13 = vpack.c.bf16 %v564_v54, %v564_v54  ;;  %v566_v15 = vpack.c.bf16 %v562_v6, %v562_v6  ;;  %v567_v11 = vpack.c.bf16 %v563_v32, %v563_v32 }
 0x196   :  { %953 = vmatprep.subr.msk.bf16.mxu0 %vm601_vm4, %v566_v15  ;;  %955 = vmatprep.subr.msk.bf16.mxu1 %vm601_vm4, %v568_v13  ;;  %v684_v38 = vsel %vm601_vm4, %v567_v11, 0 }
 0x197   :  { %698 = vmatpush1.bf16.msra.mxu0 %v678_v30  ;;  %739 = vmatpush1.bf16.msra.mxu1 %v684_v38 }
 0x19a   :  { %954 = vmatmul.mubr.msk.bf16.vlgmr.msra.gmra.mrb[8].mxu0 %vm673_vm11, %v666_v41  ;;  %956 = vmatmul.mubr.msk.bf16.vlgmr.msra.gmra.mrb[8].mxu1 %vm673_vm11, %v666_v41 }
 0x19b   :  { %846 = vmatprep.mubr.bf16.mxu0 %v1489_v48  ;;  %889 = vmatprep.mubr.bf16.mxu1 %v1489_v48 }
 0x1a1   :  { %v671_v51 = vpop.permute.xlu1 %670  ;;  %v189_v2 = vpop.permute.xlu0 %188 }
 0x1a2   :  { %v196_v62 = vadd.f32 %v189_v2, %v1050_v20  ;;  %v198_v63 = vadd.f32 %v189_v2, %v1052_v21  ;;  %v197_v0 = vadd.f32 %v189_v2, %v1058_v25  ;;  %v199_v5 = vadd.f32 %v189_v2, %v1060_v26 }
 0x1a4   :  { %v204_v22 = vmax.f32 %v196_v62, 0.0  ;;  %v206_v31 = vmax.f32 %v198_v63, 0.0  ;;  %v205_v4 = vmax.f32 %v197_v0, 0.0  ;;  %v207_v12 = vmax.f32 %v199_v5, 0.0 }
 0x1a5   :  { %v194_v27 = vpop.permute.xlu1 %193  ;;  %v786_v1 = vpop.permute.xlu0 %785 }
 0x1a6   :  { %v200_v43 = vadd.f32 %v194_v27, %v112_v33  ;;  %v202_v16 = vadd.f32 %v194_v27, %v163_v8  ;;  %v201_v49 = vadd.f32 %v194_v27, %v114_v10  ;;  %v203_v23 = vadd.f32 %v194_v27, %v165_v18 }
 0x1a8   :  { %v208_v32 = vmax.f32 %v200_v43, 0.0  ;;  %v210_v25 = vmax.f32 %v202_v16, 0.0  ;;  %v209_v30 = vmax.f32 %v201_v49, 0.0  ;;  %v211_v38 = vmax.f32 %v203_v23, 0.0 }
 0x1a9   :  { %v791_v59 = vpop.permute.xlu1 %790 }
 0x26d   :  { %v723_v46 = vpop.f32.mrb[8].mxu0  ;;  %v764_v50 = vpop.f32.mrb[8].mxu1 }
 0x26e   :  { %v724_v39 = vadd.f32 %v723_v46, %v671_v51  ;;  %v765_v29 = vadd.f32 %v764_v50, %v671_v51  ;;  %v766_v40 = vpop.f32.mrb[9].mxu1  ;;  %v725_v36 = vpop.f32.mrb[9].mxu0 }
 0x26f   :  { %v767_v9 = vadd.f32 %v766_v40, %v671_v51  ;;  %v726_v34 = vadd.f32 %v725_v36, %v671_v51  ;;  %v727_v28 = vpop.f32.mrb[10].mxu0  ;;  %v768_v35 = vpop.f32.mrb[10].mxu1 }
 0x270   :  { %v771_v52 = vmax.f32 %v724_v39, 0.0  ;;  %v773_v37 = vmax.f32 %v765_v29, 0.0  ;;  %v728_v24 = vpop.f32.mrb[11].mxu0  ;;  %v769_v55 = vpop.f32.mrb[11].mxu1 }
 0x271   :  { %v774_v3 = vmax.f32 %v767_v9, 0.0  ;;  %v772_v42 = vmax.f32 %v726_v34, 0.0 }
 0x272   :  { %v777_v56 = vpack.c.bf16 %v771_v52, %v771_v52  ;;  %v779_v58 = vpack.c.bf16 %v773_v37, %v773_v37 }
 0x273   :  { %v780_v7 = vpack.c.bf16 %v774_v3, %v774_v3  ;;  %v778_v57 = vpack.c.bf16 %v772_v42, %v772_v42 }
 0x274   :  { %v803_v17 = vsel %vm601_vm4, %v777_v56, 0  ;;  %v809_v47 = vsel %vm601_vm4, %v779_v58, 0 }
 0x275   :  { %958 = vmatprep.subr.msk.bf16.mxu0 %vm601_vm4, %v778_v57  ;;  %960 = vmatprep.subr.msk.bf16.mxu1 %vm601_vm4, %v780_v7 }
 0x276   :  { %815 = vmatpush1.bf16.msra.mxu0 %v803_v17  ;;  %858 = vmatpush1.bf16.msra.mxu1 %v809_v47 }
 0x279   :  { %959 = vmatmul.mubr.msk.bf16.vlgmr.msra.gmra.mrb[12].mxu0 %vm798_vm12, %v981_v60  ;;  %961 = vmatmul.mubr.msk.bf16.vlgmr.msra.gmra.mrb[12].mxu1 %vm798_vm12, %v981_v60 }
 0x34c   :  { %v848_v19 = vpop.f32.mrb[12].mxu0  ;;  %v891_v61 = vpop.f32.mrb[12].mxu1 }
 0x34d   :  { %v849_v54 = vadd.f32 %v848_v19, %v786_v1  ;;  %v892_v20 = vadd.f32 %v891_v61, %v786_v1  ;;  %v850_v6 = vpop.f32.mrb[13].mxu0  ;;  %v893_v21 = vpop.f32.mrb[13].mxu1 }
 0x34e   :  { %v851_v13 = vadd.f32 %v850_v6, %v786_v1  ;;  %v894_v26 = vadd.f32 %v893_v21, %v786_v1  ;;  %v852_v15 = vpop.f32.mrb[14].mxu0  ;;  %v895_v11 = vpop.f32.mrb[14].mxu1 }
 0x34f   :  { %v900_v41 = vmax.f32 %v849_v54, 0.0  ;;  %v902_v48 = vmax.f32 %v892_v20, 0.0  ;;  %v853_v33 = vadd.f32 %v852_v15, %v791_v59  ;;  %v896_v8 = vadd.f32 %v895_v11, %v791_v59  ;;  %v854_v10 = vpop.f32.mrb[15].mxu0  ;;  %v897_v18 = vpop.f32.mrb[15].mxu1 }
 0x350   :  { %v901_v14 = vmax.f32 %v851_v13, 0.0  ;;  %v903_v44 = vmax.f32 %v894_v26, 0.0  ;;  %v855_v45 = vadd.f32 %v854_v10, %v791_v59  ;;  %v898_v53 = vadd.f32 %v897_v18, %v791_v59 }
 0x351   :  { %v908_v51 = vadd.f32 %v900_v41, %v204_v22  ;;  %v910_v46 = vadd.f32 %v902_v48, %v206_v31  ;;  %v904_v50 = vmax.f32 %v853_v33, 0.0  ;;  %v906_v39 = vmax.f32 %v896_v8, 0.0 }
 0x352   :  { %v909_v29 = vadd.f32 %v901_v14, %v205_v4  ;;  %v911_v40 = vadd.f32 %v903_v44, %v207_v12  ;;  %v905_v36 = vmax.f32 %v855_v45, 0.0  ;;  %v907_v9 = vmax.f32 %v898_v53, 0.0 }
 0x353   :  { %v916_v34 = vmax.f32 %v908_v51, 0.0  ;;  %v918_v28 = vmax.f32 %v910_v46, 0.0  ;;  %v912_v35 = vadd.f32 %v904_v50, %v208_v32  ;;  %v914_v52 = vadd.f32 %v906_v39, %v210_v25 }
 0x354   :  { %v917_v37 = vmax.f32 %v909_v29, 0.0  ;;  %v919_v24 = vmax.f32 %v911_v40, 0.0  ;;  %v913_v55 = vadd.f32 %v905_v36, %v209_v30  ;;  %v915_v3 = vadd.f32 %v907_v9, %v211_v38 }
 0x355   :  { %924 = vst [vmem:[%s1474_s6] sm:$0xff] %v916_v34  ;;  %962 = vst [vmem:[%s1474_s6 + $0x20] sm:$0xff] %v918_v28  ;;  %v920_v42 = vmax.f32 %v912_v35, 0.0  ;;  %v922_v56 = vmax.f32 %v914_v52, 0.0 }
 0x356   :  { %925 = vst [vmem:[%s1474_s6 + $0x8] sm:$0xff] %v917_v37  ;;  %963 = vst [vmem:[%s1474_s6 + $0x28] sm:$0xff] %v919_v24  ;;  %v921_v58 = vmax.f32 %v913_v55, 0.0  ;;  %v923_v7 = vmax.f32 %v915_v3, 0.0 }
 0x357   :  { %926 = vst [vmem:[%s1474_s6 + $0x10] sm:$0xff] %v920_v42  ;;  %964 = vst [vmem:[%s1474_s6 + $0x30] sm:$0xff] %v922_v56 }
 0x358   :  { %927 = vst [vmem:[%s1474_s6 + $0x18] sm:$0xff] %v921_v58  ;;  %965 = vst [vmem:[%s1474_s6 + $0x38] sm:$0xff] %v923_v7 }

</bundles_post_ra>
